<compile_context>
chip_gen: v5e
topology: v5e:2x2
jax: 0.10.0
libtpu: 0.0.40
codegen_flags: <defaults>
</compile_context>

<pallas_src>
import jax
import jax.numpy as jnp
from jax import lax
from jax.experimental import pallas as pl
from jax.experimental.pallas import tpu as pltpu

ASTROUS_LIST = (1, 2, 4, 8, 1, 1)
BN_EPS = 1e-5


def _make_conv3x3_kernel(dil, leaky, residual, fuse_base):
    """Fused conv3x3(dilation=dil, pad=dil) + scale/bias + [LeakyReLU] +
    [identity residual] + [base add + ReLU], NHWC, one image per grid step."""
    d = dil

    def kernel(*refs):
        if fuse_base:
            x_ref, base_ref, w_ref, scale_ref, bias_ref, o_ref = refs
        else:
            x_ref, w_ref, scale_ref, bias_ref, o_ref = refs

        H, W, Cin = x_ref.shape[1], x_ref.shape[2], x_ref.shape[3]
        Cout = o_ref.shape[3]

        x = x_ref[0]                                   # (H, W, Cin), storage dtype
        cdt = x.dtype

        # Collapse the 3 kw taps once: kw-shifted copies of x concatenated along the
        # channel (lane) axis.  Zero columns supply the width halo in-kernel.
        zc = jnp.zeros((H, d, Cin), cdt)
        chunk0 = jnp.concatenate([zc, x[:, :W - d, :]], axis=1)   # shift right by d
        chunk2 = jnp.concatenate([x[:, d:, :], zc], axis=1)       # shift left  by d
        xk = jnp.concatenate([chunk0, x, chunk2], axis=2)         # (H, W, 3*Cin)

        # Height halo: zero rows above/below (leading-dim concat, cheap).
        zr = jnp.zeros((d, W, 3 * Cin), cdt)
        xkp = jnp.concatenate([zr, xk, zr], axis=0)               # (H+2d, W, 3*Cin)

        # Flatten spatial onto sublanes (layout-preserving for W % 8 == 0) so each
        # kh shift is a sublane-aligned row-block slice and the MXU sees one
        # (H*W, 3*Cin) x (3*Cin, Cout) matmul per kh (3 matmuls total, not 9).
        xk2 = xkp.reshape((H + 2 * d) * W, 3 * Cin)

        acc = jnp.zeros((H * W, Cout), jnp.float32)
        for kh in range(3):
            part = xk2[kh * d * W: kh * d * W + H * W]            # (H*W, 3*Cin)
            acc = acc + jnp.dot(part, w_ref[kh],
                                preferred_element_type=jnp.float32)

        # f32 epilogue: folded BN (or plain conv bias), activation, residual.
        y = acc * scale_ref[...] + bias_ref[...]
        if leaky:
            y = jnp.where(y > 0, y, 0.2 * y)
        if residual:                                   # downsample=None, Cin == Cout
            y = y + x.reshape(H * W, Cin).astype(jnp.float32)
        if fuse_base:                                  # + twice_disparity, then ReLU
            y = y + base_ref[0].reshape(H * W, Cout).astype(jnp.float32)
            y = jnp.maximum(y, 0.0)
        o_ref[0] = y.reshape(H, W, Cout).astype(o_ref.dtype)

    return kernel


def _conv3x3_layer(x_nhwc, w_oihw, conv_b, bn, dil, *, leaky, residual,
                   base=None, out_dtype=None):
    """One fused convbn(+act)(+residual)(+base,relu) layer as a pallas_call."""
    N, H, W, Cin = x_nhwc.shape
    Cout = w_oihw.shape[0]
    storage = x_nhwc.dtype
    out_dtype = storage if out_dtype is None else out_dtype
    if residual:
        assert Cin == Cout, "identity residual requires in_channel == out_channel"

    # Weights OIHW -> (KH, KW*Cin, Cout); rows ordered (kw, ci) to match the
    # in-kernel kw channel-concat.  Stored in the activation (bf16) dtype.
    w = jnp.transpose(w_oihw, (2, 3, 1, 0)).reshape(3, 3 * Cin, Cout).astype(storage)

    # Fold inference BatchNorm (+ conv bias) into per-channel scale/bias (f32).
    if bn is None:
        scale = jnp.ones((Cout,), jnp.float32)
        bias = conv_b.astype(jnp.float32)
    else:
        gamma, beta, mean, var = bn
        scale = (gamma / jnp.sqrt(var + BN_EPS)).astype(jnp.float32)
        bias = (scale * (conv_b - mean) + beta).astype(jnp.float32)
    scale = scale.reshape(1, Cout)
    bias = bias.reshape(1, Cout)

    in_specs = [pl.BlockSpec((1, H, W, Cin), lambda n: (n, 0, 0, 0))]
    inputs = [x_nhwc]
    if base is not None:
        in_specs.append(pl.BlockSpec((1, H, W, Cout), lambda n: (n, 0, 0, 0)))
        inputs.append(base)
    in_specs += [
        pl.BlockSpec((3, 3 * Cin, Cout), lambda n: (0, 0, 0)),
        pl.BlockSpec((1, Cout), lambda n: (0, 0)),
        pl.BlockSpec((1, Cout), lambda n: (0, 0)),
    ]
    inputs += [w, scale, bias]

    kernel = _make_conv3x3_kernel(dil, leaky, residual, base is not None)

    # TODO(synk): for production H*W add a row-tile grid axis (manual halo DMA) so the
    # working set stays under v7x's 64 MiB VMEM; whole-image tiles are fine at these shapes.
    return pl.pallas_call(
        kernel,
        out_shape=jax.ShapeDtypeStruct((N, H, W, Cout), out_dtype),
        grid_spec=pltpu.PrefetchScalarGridSpec(
            num_scalar_prefetch=0,
            grid=(N,),
            in_specs=in_specs,
            out_specs=pl.BlockSpec((1, H, W, Cout), lambda n: (n, 0, 0, 0)),
        ),
        compiler_params=pltpu.CompilerParams(
            dimension_semantics=("parallel",),
            vmem_limit_bytes=32 * 1024 * 1024),
    )(*inputs)


def _upsample_bilinear(x_nhw, out_h, out_w):
    """PyTorch F.interpolate(mode='bilinear', align_corners=False) on (N, h, w)."""
    # TODO(synk): bilinear upsample of the tiny low-res disparity is plain-JAX glue,
    # not lowered to a Pallas kernel.
    n, h, w = x_nhw.shape

    def src(out_size, in_size):
        scale = in_size / out_size
        s = (jnp.arange(out_size, dtype=jnp.float32) + 0.5) * scale - 0.5
        s = jnp.maximum(s, 0.0)
        i0 = jnp.minimum(jnp.floor(s).astype(jnp.int32), in_size - 1)
        i1 = jnp.minimum(i0 + 1, in_size - 1)
        return i0, i1, s - i0.astype(jnp.float32)

    y0, y1, fy = src(out_h, h)
    x0, x1, fx = src(out_w, w)
    rows = (x_nhw[:, y0, :] * (1.0 - fy)[None, :, None]
            + x_nhw[:, y1, :] * fy[None, :, None])
    return (rows[:, :, x0] * (1.0 - fx)[None, None, :]
            + rows[:, :, x1] * fx[None, None, :])


def edge_aware_refinement_forward(low_disparity, rgb_nchw, params,
                                  storage_dtype=jnp.bfloat16):
    """Pallas EdgeAwareRefinement.forward.
    low_disparity: (N, h, w) f32; rgb_nchw: (N, 3, H, W) f32  ->  (N, H, W) f32."""
    N, h, w = low_disparity.shape
    H, W = rgb_nchw.shape[-2:]

    twice = _upsample_bilinear(low_disparity.astype(jnp.float32), H, W)
    if W / w >= 1.5:                                   # static shape condition
        twice = twice * 8.0

    # Stay NHWC end-to-end; the only layout change is this single input transpose.
    rgb = jnp.transpose(rgb_nchw, (0, 2, 3, 1))
    x = jnp.concatenate([twice[..., None], rgb], axis=-1).astype(storage_dtype)

    # conv2d_feature: 4 -> 32, dilation 1, BN + LeakyReLU.
    p = params["feat"]
    x = _conv3x3_layer(x, p["w"], p["b"], p["bn"], 1, leaky=True, residual=False)

    # 6 residual astrous BasicBlocks (stride 1, downsample=None).
    for dil, p in zip(ASTROUS_LIST, params["blocks"]):
        x = _conv3x3_layer(x, p["w"], p["b"], p["bn"], dil, leaky=True, residual=True)

    # conv2d_out: 32 -> 1, fused with "+ twice_disparity" and final ReLU.
    p = params["out"]
    out = _conv3x3_layer(x, p["w"], p["b"], None, 1, leaky=False, residual=False,
                         base=twice[..., None].astype(jnp.float32),
                         out_dtype=jnp.float32)
    return out[..., 0]                                 # squeeze(dim=1)


def _reference_forward(low_disparity, rgb_nchw, params,
                       storage_dtype=jnp.bfloat16):
    """Plain-JAX (lax.conv) reference mirroring the module, with the same bf16
    storage points as the Pallas pipeline."""
    N, h, w = low_disparity.shape
    H, W = rgb_nchw.shape[-2:]
    twice = _upsample_bilinear(low_disparity.astype(jnp.float32), H, W)
    if W / w >= 1.5:
        twice = twice * 8.0

    def convbn(x, p, dil, leaky, residual, bn=True):
        y = lax.conv_general_dilated(
            x.astype(storage_dtype), p["w"].astype(storage_dtype),
            window_strides=(1, 1), padding=((dil, dil), (dil, dil)),
            rhs_dilation=(dil, dil),
            dimension_numbers=("NCHW", "OIHW", "NCHW"),
            preferred_element_type=jnp.float32)
        y = y + p["b"][None, :, None, None]
        if bn:
            g, be, m, v = p["bn"]
            y = (y - m[None, :, None, None]) / jnp.sqrt(v[None, :, None, None] + BN_EPS)
            y = y * g[None, :, None, None] + be[None, :, None, None]
        if leaky:
            y = jnp.where(y > 0, y, 0.2 * y)
        if residual:
            y = y + x.astype(jnp.float32)
        return y

    x = jnp.concatenate([twice[:, None], rgb_nchw], axis=1).astype(storage_dtype)
    x = convbn(x, params["feat"], 1, True, False).astype(storage_dtype)
    for dil, p in zip(ASTROUS_LIST, params["blocks"]):
        x = convbn(x, p, dil, True, True).astype(storage_dtype)
    y = convbn(x, params["out"], 1, False, False, bn=False)
    return jnp.maximum(twice[:, None] + y, 0.0)[:, 0]


if __name__ == "__main__":
    N, H, W = 2, 16, 16          # rgb spatial size
    h, w = 8, 8                  # low-res disparity size (ratio 2 -> "*8" branch)
    CH, IN_CH = 32, 4            # module: in_channel = 1 (disparity) + 3 (rgb)

    keys = iter(jax.random.split(jax.random.PRNGKey(0), 64))

    def convbn_params(cin, cout, with_bn=True):
        p = dict(
            w=jax.random.normal(next(keys), (cout, cin, 3, 3), jnp.float32) * 0.1,
            b=jax.random.normal(next(keys), (cout,), jnp.float32) * 0.1)
        if with_bn:
            p["bn"] = (
                jax.random.uniform(next(keys), (cout,), jnp.float32, 0.5, 1.5),  # gamma
                jax.random.normal(next(keys), (cout,), jnp.float32) * 0.1,       # beta
                jax.random.normal(next(keys), (cout,), jnp.float32) * 0.1,       # mean
                jax.random.uniform(next(keys), (cout,), jnp.float32, 0.5, 1.5))  # var
        return p

    params = dict(
        feat=convbn_params(IN_CH, CH),
        blocks=[convbn_params(CH, CH) for _ in ASTROUS_LIST],
        out=convbn_params(CH, 1, with_bn=False),
    )

    low_disparity = jax.random.uniform(next(keys), (N, h, w), jnp.float32)
    rgb = jax.random.normal(next(keys), (N, 3, H, W), jnp.float32)

    out = jax.block_until_ready(
        edge_aware_refinement_forward(low_disparity, rgb, params))
    assert out.shape == (N, H, W)

    ref = jax.block_until_ready(_reference_forward(low_disparity, rgb, params))
    assert jnp.allclose(out, ref, atol=5e-2, rtol=5e-2), (
        f"mismatch vs reference: max_abs_err={float(jnp.max(jnp.abs(out - ref)))}")

    print("KERNEL_OK")
</pallas_src>

<mosaic_0001>
module attributes {stable_mosaic.version = 11 : i64} {
  func.func @kernel(%arg0: i32, %arg1: memref<1x16x16x4xbf16, #tpu.memory_space<vmem>>, %arg2: memref<3x12x32xbf16, #tpu.memory_space<vmem>>, %arg3: memref<1x32xf32, #tpu.memory_space<vmem>>, %arg4: memref<1x32xf32, #tpu.memory_space<vmem>>, %arg5: memref<1x16x16x32xbf16, #tpu.memory_space<vmem>>) attributes {dimension_semantics = [#tpu.dimension_semantics<parallel>], iteration_bounds = array<i64: 2>, scalar_prefetch = 0 : i64, scratch_operands = 0 : i64, tpu.core_type = #tpu.core_type<tc>, window_params = [{transform_indices = @transform_0, window_bounds = array<i64: 1, 16, 16, 4>}, {pipeline_mode = #tpu.pipeline_mode<synchronous>, transform_indices = @transform_1, window_bounds = array<i64: 3, 12, 32>}, {pipeline_mode = #tpu.pipeline_mode<synchronous>, transform_indices = @transform_2, window_bounds = array<i64: 1, 32>}, {pipeline_mode = #tpu.pipeline_mode<synchronous>, transform_indices = @transform_3, window_bounds = array<i64: 1, 32>}, {transform_indices = @transform_4, window_bounds = array<i64: 1, 16, 16, 32>}]} {
    %c0 = arith.constant 0 : index
    %c0_0 = arith.constant 0 : index
    %c0_1 = arith.constant 0 : index
    %c0_2 = arith.constant 0 : index
    %0 = vector.load %arg1[%c0, %c0_0, %c0_1, %c0_2] : memref<1x16x16x4xbf16, #tpu.memory_space<vmem>>, vector<1x16x16x4xbf16>
    %1 = vector.shape_cast %0 : vector<1x16x16x4xbf16> to vector<16x16x4xbf16>
    %cst = arith.constant 0.000000e+00 : bf16
    %2 = vector.broadcast %cst : bf16 to vector<16x1x4xbf16>
    %3 = vector.extract_strided_slice %1 {offsets = [0, 0, 0], sizes = [16, 15, 4], strides = [1, 1, 1]} : vector<16x16x4xbf16> to vector<16x15x4xbf16>
    %4 = tpu.concatenate %2, %3 in 1 : vector<16x1x4xbf16>, vector<16x15x4xbf16> -> vector<16x16x4xbf16>
    %5 = vector.extract_strided_slice %1 {offsets = [0, 1, 0], sizes = [16, 15, 4], strides = [1, 1, 1]} : vector<16x16x4xbf16> to vector<16x15x4xbf16>
    %6 = tpu.concatenate %5, %2 in 1 : vector<16x15x4xbf16>, vector<16x1x4xbf16> -> vector<16x16x4xbf16>
    %7 = tpu.concatenate %4, %1, %6 in 2 : vector<16x16x4xbf16>, vector<16x16x4xbf16>, vector<16x16x4xbf16> -> vector<16x16x12xbf16>
    %cst_3 = arith.constant 0.000000e+00 : bf16
    %8 = vector.broadcast %cst_3 : bf16 to vector<1x16x12xbf16>
    %9 = tpu.concatenate %8, %7, %8 in 0 : vector<1x16x12xbf16>, vector<16x16x12xbf16>, vector<1x16x12xbf16> -> vector<18x16x12xbf16>
    %10 = vector.shape_cast %9 : vector<18x16x12xbf16> to vector<288x12xbf16>
    %cst_4 = arith.constant 0.000000e+00 : f32
    %11 = vector.broadcast %cst_4 : f32 to vector<256x32xf32>
    %12 = vector.extract_strided_slice %10 {offsets = [0, 0], sizes = [256, 12], strides = [1, 1]} : vector<288x12xbf16> to vector<256x12xbf16>
    %c0_5 = arith.constant 0 : index
    %c0_6 = arith.constant 0 : index
    %c0_7 = arith.constant 0 : index
    %13 = vector.load %arg2[%c0_5, %c0_6, %c0_7] : memref<3x12x32xbf16, #tpu.memory_space<vmem>>, vector<1x12x32xbf16>
    %14 = vector.shape_cast %13 : vector<1x12x32xbf16> to vector<12x32xbf16>
    %cst_8 = arith.constant dense<0.000000e+00> : vector<256x32xf32>
    %15 = tpu.matmul %12, %14, %cst_8 {dimension_numbers = #tpu.dot_dimension_numbers<[1], [0], [0], [1], [0, 0, 1, 1], [], []>} : vector<256x12xbf16>, vector<12x32xbf16>, vector<256x32xf32> -> vector<256x32xf32>
    %16 = arith.addf %11, %15 : vector<256x32xf32>
    %17 = vector.extract_strided_slice %10 {offsets = [16, 0], sizes = [256, 12], strides = [1, 1]} : vector<288x12xbf16> to vector<256x12xbf16>
    %c1 = arith.constant 1 : index
    %c0_9 = arith.constant 0 : index
    %c0_10 = arith.constant 0 : index
    %18 = vector.load %arg2[%c1, %c0_9, %c0_10] : memref<3x12x32xbf16, #tpu.memory_space<vmem>>, vector<1x12x32xbf16>
    %19 = vector.shape_cast %18 : vector<1x12x32xbf16> to vector<12x32xbf16>
    %cst_11 = arith.constant dense<0.000000e+00> : vector<256x32xf32>
    %20 = tpu.matmul %17, %19, %cst_11 {dimension_numbers = #tpu.dot_dimension_numbers<[1], [0], [0], [1], [0, 0, 1, 1], [], []>} : vector<256x12xbf16>, vector<12x32xbf16>, vector<256x32xf32> -> vector<256x32xf32>
    %21 = arith.addf %16, %20 : vector<256x32xf32>
    %22 = vector.extract_strided_slice %10 {offsets = [32, 0], sizes = [256, 12], strides = [1, 1]} : vector<288x12xbf16> to vector<256x12xbf16>
    %c2 = arith.constant 2 : index
    %c0_12 = arith.constant 0 : index
    %c0_13 = arith.constant 0 : index
    %23 = vector.load %arg2[%c2, %c0_12, %c0_13] : memref<3x12x32xbf16, #tpu.memory_space<vmem>>, vector<1x12x32xbf16>
    %24 = vector.shape_cast %23 : vector<1x12x32xbf16> to vector<12x32xbf16>
    %cst_14 = arith.constant dense<0.000000e+00> : vector<256x32xf32>
    %25 = tpu.matmul %22, %24, %cst_14 {dimension_numbers = #tpu.dot_dimension_numbers<[1], [0], [0], [1], [0, 0, 1, 1], [], []>} : vector<256x12xbf16>, vector<12x32xbf16>, vector<256x32xf32> -> vector<256x32xf32>
    %26 = arith.addf %21, %25 : vector<256x32xf32>
    %c0_15 = arith.constant 0 : index
    %c0_16 = arith.constant 0 : index
    %27 = vector.load %arg3[%c0_15, %c0_16] : memref<1x32xf32, #tpu.memory_space<vmem>>, vector<1x32xf32>
    %28 = vector.broadcast %27 : vector<1x32xf32> to vector<256x32xf32>
    %29 = arith.mulf %26, %28 : vector<256x32xf32>
    %c0_17 = arith.constant 0 : index
    %c0_18 = arith.constant 0 : index
    %30 = vector.load %arg4[%c0_17, %c0_18] : memref<1x32xf32, #tpu.memory_space<vmem>>, vector<1x32xf32>
    %31 = vector.broadcast %30 : vector<1x32xf32> to vector<256x32xf32>
    %32 = arith.addf %29, %31 : vector<256x32xf32>
    %cst_19 = arith.constant 0.000000e+00 : f32
    %33 = vector.broadcast %cst_19 : f32 to vector<256x32xf32>
    %34 = arith.cmpf ogt, %32, %33 : vector<256x32xf32>
    %cst_20 = arith.constant 2.000000e-01 : f32
    %35 = vector.broadcast %cst_20 : f32 to vector<256x32xf32>
    %36 = arith.mulf %35, %32 : vector<256x32xf32>
    %37 = arith.select %34, %32, %36 : vector<256x32xi1>, vector<256x32xf32>
    %38 = vector.shape_cast %37 : vector<256x32xf32> to vector<16x16x32xf32>
    %39 = arith.truncf %38 : vector<16x16x32xf32> to vector<16x16x32xbf16>
    %c0_21 = arith.constant 0 : index
    %c0_22 = arith.constant 0 : index
    %c0_23 = arith.constant 0 : index
    %c0_24 = arith.constant 0 : index
    %40 = vector.load %arg5[%c0_21, %c0_22, %c0_23, %c0_24] : memref<1x16x16x32xbf16, #tpu.memory_space<vmem>>, vector<1x16x16x32xbf16>
    %41 = vector.shape_cast %40 : vector<1x16x16x32xbf16> to vector<16x16x32xbf16>
    %42 = vector.shape_cast %39 : vector<16x16x32xbf16> to vector<1x16x16x32xbf16>
    tpu.vector_store %arg5[%c0_21, %c0_22, %c0_23, %c0_24], %42 {strides = array<i32>} : memref<1x16x16x32xbf16, #tpu.memory_space<vmem>>, vector<1x16x16x32xbf16>,
    return
  }
  func.func @transform_0(%arg0: i32) -> (i32, i32, i32, i32) {
    %c0_i32 = arith.constant 0 : i32
    %c0_i32_0 = arith.constant 0 : i32
    %c0_i32_1 = arith.constant 0 : i32
    %c0_i32_2 = arith.constant 0 : i32
    return %arg0, %c0_i32, %c0_i32_0, %c0_i32_1 : i32, i32, i32, i32
  }
  func.func @transform_1(%arg0: i32) -> (i32, i32, i32) {
    %c0_i32 = arith.constant 0 : i32
    %c0_i32_0 = arith.constant 0 : i32
    %c0_i32_1 = arith.constant 0 : i32
    %c0_i32_2 = arith.constant 0 : i32
    return %c0_i32, %c0_i32_0, %c0_i32_1 : i32, i32, i32
  }
  func.func @transform_2(%arg0: i32) -> (i32, i32) {
    %c0_i32 = arith.constant 0 : i32
    %c0_i32_0 = arith.constant 0 : i32
    %c0_i32_1 = arith.constant 0 : i32
    return %c0_i32, %c0_i32_0 : i32, i32
  }
  func.func @transform_3(%arg0: i32) -> (i32, i32) {
    %c0_i32 = arith.constant 0 : i32
    %c0_i32_0 = arith.constant 0 : i32
    %c0_i32_1 = arith.constant 0 : i32
    return %c0_i32, %c0_i32_0 : i32, i32
  }
  func.func @transform_4(%arg0: i32) -> (i32, i32, i32, i32) {
    %c0_i32 = arith.constant 0 : i32
    %c0_i32_0 = arith.constant 0 : i32
    %c0_i32_1 = arith.constant 0 : i32
    %c0_i32_2 = arith.constant 0 : i32
    return %arg0, %c0_i32, %c0_i32_0, %c0_i32_1 : i32, i32, i32, i32
  }
}

</mosaic_0001>

<bundles_post_ra>
// kernel: tpu_custom_call.1
= control target key start
LH: loop header
LB: loop body
LE: loop exit
PB: predicated region body
PF: predicated region fallthrough
CT: control target
= control target key end

     0   :  { %9 = vsyncpa [#allocation3], 0  ;;  %s2407_s0 = inlined_call_operand.vmem [shape: bf16[2,16,16,4], index: 0, kind: input, shape index: {}]   ;;  %s2408_s1 = inlined_call_operand.vmem [shape: bf16[3,12,32], index: 1, kind: input, shape index: {}]   ;;  %s2409_s2 = inlined_call_operand.vmem [shape: f32[1,32], index: 2, kind: input, shape index: {}]   ;;  %s2410_s3 = inlined_call_operand.vmem [shape: f32[1,32], index: 3, kind: input, shape index: {}]   ;;  %s2411_s4 = inlined_call_operand.hbm [shape: bf16[2,16,16,32], index: 4, kind: output, shape index: {}]  }
   0x1   :  { %11 = vsyncpa [#allocation3 + $0x1], 0  ;;  %s1664_s15 = smov 0   ;;  %s1666_s16 = smov 0  }
   0x2   :  { %s1668_s17 = smov 0   ;;  %s1670_s18 = smov 0  }
   0x3 LB: > { %s1685_s19 = sadd.s32 4294967295, %s1633_s18   ;;  %s1364_s20 = sadd.s32 4294967294, %s1633_s18   ;;  %s1633_s18 = sphi %s1670_s18, %s2421_s18   ;;  %s1629_s17 = sphi %s1668_s17, %s2420_s17   ;;  %s1625_s16 = sphi %s1666_s16, %s2419_s16   ;;  %s1621_s15 = sphi %s1664_s15, %s2418_s15  }
   0x4   : > { %s1689_s21 = sadd.s32 1, %s1633_s18   ;;  %s113_s22 = sadd.s32 1, %s1629_s17 }
   0x5   : > { %s110_s23 = ssub.s32 %s1633_s18, %s1689_s21  ;;  %p123_p0 = scmp.ne.s32.totalorder %s1629_s17, %s1625_s16 }
   0x6   : > { %p111_p1 = scmp.eq.s32.totalorder %s110_s23, 0  ;;  %p124_p2 = scmp.eq.s32.totalorder %s1685_s19, 1 }
   0x7   : > { %p129_p3 = scmp.ne.s32.totalorder %s1625_s16, %s1621_s15  ;;  %p130_p4 = scmp.eq.s32.totalorder %s1364_s20, 1 }
   0x8   : > { %s1700_s24 = scalar_select %p111_p1, %s1629_s17, %s113_s22  }
   0x9   : > { %p1702_p5 = por %p124_p2, %p123_p0  ;;  %p1706_p6 = por %p130_p4, %p129_p3 }
   0xa   : > { %p1367_p7 = scmp.ge.s32.totalorder %s1633_s18, 1  ;;  %p165_p8 = scmp.lt.s32.totalorder %s1633_s18, 3 }
   0xc   : > { %p166_p9 = pnand %p1367_p7, %p165_p8 }
   0xd   : > { %p191_p10 = scmp.lt.s32.totalorder (!%p166_p9), %s1685_s19, 1  ;;  %s1635_s6 = smov (!%p166_p9), 4  }
   0xe   : > { %169 = sbr.rel (%p166_p9) target bundleno = 486 (0x1e6), region = 36  ;;  %s1636_s7 = smov (!%p166_p9), 8  }
   0xf   : > { %s188_s8 = sand.u32 (!%p166_p9), 1, %s1625_s16   ;;  %s1522_s11 = sshll.u32 (!%p166_p9), %s1685_s19, 7 }
  0x10   : > { %s1368_s9 = sshll.u32 (!%p166_p9), %s188_s8, 7  ;;  %s1298_s14 = scalar_lea.hbm (!%p166_p9), %s2411_s4, %s1522_s11 }
  0x11   : > { %s2182_s10 = scalar_lea.vmem (!%p166_p9), [#allocation2], %s1368_s9  ;;  %s1287_s22 = scalar_lea.sflag (!%p166_p9), [#allocation3], %s188_s8 }
  0x12   : > { %s1299_s20 = sshll.u32 (!%p166_p9), %s2182_s10, 4  ;;  %s1591_s30 = scalar_lea.hbm (!%p166_p9), %s2411_s4, 256  ;;  %s1300_s20 = int_to_ptr.vmem [resolvable:$true] %s1299_s20 }
  0x13   : > { %s192_s27 = scalar_select %p191_p10, %s1685_s19, 1  ;;  %vm504_vm0 = vcmask 1047552   ;;  %vm505_vm1 = vsmask.f32 7424  ;;  %v1459_v46 = vld [vmem:[%s2408_s1] sm:$0xf] }
  0x14   : > { %vm1739_vm2 = vmand %vm504_vm0, %vm505_vm1  ;;  %v1519_v47 = vld [vmem:[%s2408_s1] sm:$0x30]  ;;  %vm728_vm3 = vcmask 1045504   ;;  %v1637_v62 = vmov 0   ;;  %vm437_vm4 = vcmask 1040384   ;;  %vm603_vm7 = vcmask 31744  }
  0x15   : > { %s1502_s28 = sshll.u32 %s192_s27, 7  ;;  %v1460_v50 = vor.u32 %v1519_v47, %v1459_v46  ;;  %vm438_vm5 = vsmask.f32 256  ;;  %vm652_vm8 = vcmask 64512   ;;  %vm695_vm9 = vcmask 97280   ;;  %s1301_s19 = sshll.u32 %s1298_s14, 4  ;;  %s1302_s19 = int_to_ptr.hbm [resolvable:$true] %s1301_s19 }
  0x16   : > { %s1717_s5 = scalar_lea.vmem %s2407_s0, %s1502_s28  ;;  %vm1945_vm6 = vmand %vm437_vm4, %vm438_vm5  ;;  %vm1253_vm11 = vcmask 257024   ;;  %s1585_s23 = sshra.s32 %s1302_s19, 4  ;;  %s1586_s23 = int_to_ptr.hbm [resolvable:$true] %s1585_s23 }
  0x17   : > { %v1720_v0 = vld [vmem:[%s1717_s5 + $0x8] sm:$0xff]  ;;  %v1723_v1 = vld [vmem:[%s1717_s5] sm:$0xff]  ;;  %v1758_v17 = vld [vmem:[%s1717_s5 + $0x10] sm:$0xff]  ;;  %v830_v53 = vsel %vm728_vm3, %v1460_v50, 0  ;;  %s1587_s27 = scalar_lea.hbm %s1586_s23, 128  ;;  %p1592_p0 = scmp.lt.s32.totalorder %s1586_s23, %s2411_s4 }
  0x18   : > { %v1726_v2 = vld [vmem:[%s1717_s5 + $0x60] sm:$0xff]  ;;  %525 = vrot.lane.b32.xlu0 %v1720_v0, %s1635_s6  ;;  %v317_v3 = vshrl.u32 %v1720_v0, 16  ;;  %v320_v4 = vshll.u32 %v1720_v0, 16  ;;  %523 = vrot.lane.b32.xlu2 %v1723_v1, %s1635_s6  ;;  %v310_v6 = vshrl.u32 %v1723_v1, 16  ;;  %v313_v7 = vshll.u32 %v1723_v1, 16  ;;  %v1753_v15 = vld [vmem:[%s1717_s5 + $0x68] sm:$0xff]  ;;  %p1588_p11 = scmp.ne.s32.totalorder %s1586_s23, %s1587_s27  ;;  %p1593_p1 = scmp.lt.s32.totalorder %s1591_s30, %s1587_s27 }
  0x19   : > { %v397_v5 = vshll.u32 %v1726_v2, 16  ;;  %v394_v12 = vshrl.u32 %v1726_v2, 16  ;;  %v324_v20 = vshrl.u32 %v1758_v17, 16  ;;  %v327_v21 = vshll.u32 %v1758_v17, 16  ;;  %v1781_v28 = vld [vmem:[%s1717_s5 + $0x18] sm:$0xff]  ;;  %v1793_v32 = vld [vmem:[%s1717_s5 + $0x70] sm:$0xff]  ;;  %839 = vmatpush.bf16.msra.mxu1 %v830_v53 }
  0x1a   : > { %v458_v8 = vrot.slane %v320_v4, 1  ;;  %v456_v10 = vrot.slane %v313_v7, 1  ;;  %v404_v22 = vshll.u32 %v1753_v15, 16  ;;  %v401_v26 = vshrl.u32 %v1753_v15, 16  ;;  %v1812_v40 = vld [vmem:[%s1717_s5 + $0x20] sm:$0xff]  ;;  %v1817_v42 = vld [vmem:[%s1717_s5 + $0x78] sm:$0xff]  ;;  %p1589_p12 = pnand %p1588_p11, %p1702_p5  ;;  %p1594_p2 = por %p1593_p1, %p1592_p0 }
  0x1b   : > { %v480_v13 = vrot.slane %v397_v5, 1  ;;  %v460_v23 = vrot.slane %v327_v21, 1  ;;  %v334_v31 = vshll.u32 %v1781_v28, 16  ;;  %v331_v34 = vshrl.u32 %v1781_v28, 16  ;;  %v1820_v43 = vld [vmem:[%s1717_s5 + $0x28] sm:$0xff]  ;;  %v1850_v58 = vld [vmem:[%s1717_s5 + $0x58] sm:$0xff] }
  0x1c   : > { %v459_v11 = vor.u32 %v458_v8, %v317_v3  ;;  %v457_v14 = vor.u32 %v456_v10, %v310_v6  ;;  %v482_v27 = vrot.slane %v404_v22, 1  ;;  %v411_v36 = vshll.u32 %v1793_v32, 16  ;;  %840 = vmatmul.bf16.vlgmr.msra.gmra.mxu1 %v1637_v62  ;;  %v1917_v47 = vld [vmem:[%s1717_s5 + $0x40] sm:$0xff]  ;;  %v1521_v50 = vld [vmem:[%s2408_s1 + $0x10] sm:$0x30]  ;;  %p1590_p13 = pneg %p1589_p12 }
  0x1d   : > { %v481_v19 = vor.u32 %v480_v13, %v394_v12  ;;  %v461_v25 = vor.u32 %v460_v23, %v324_v20  ;;  %v462_v35 = vrot.slane %v334_v31, 1  ;;  %v408_v38 = vshrl.u32 %v1793_v32, 16 }
  0x1e   : > { %v508_v16 = vsel %vm1739_vm2, %v459_v11, 0  ;;  %v507_v18 = vsel %vm1739_vm2, %v457_v14, 0  ;;  %v483_v30 = vor.u32 %v482_v27, %v401_v26  ;;  %v484_v39 = vrot.slane %v411_v36, 1  ;;  %v1893_v27 = vld [vmem:[%s1717_s5 + $0x38] sm:$0xff]  ;;  %p1595_p3 = pnand %p1594_p2, %p1590_p13 }
  0x1f   : > { %573 = vrot.lane.b32.xlu1 %v508_v16, %s1636_s7  ;;  %v519_v24 = vsel %vm1739_vm2, %v481_v19, 0  ;;  %v509_v29 = vsel %vm1739_vm2, %v461_v25, 0  ;;  %v463_v37 = vor.u32 %v462_v35, %v331_v34  ;;  %v415_v44 = vshrl.u32 %v1817_v42, 16 }
  0x20   : > { %547 = vrot.lane.b32.xlu0 %v1726_v2, %s1635_s6  ;;  %571 = vrot.lane.b32.xlu2 %v507_v18, %s1636_s7  ;;  %v520_v33 = vsel %vm1739_vm2, %v483_v30, 0  ;;  %v418_v45 = vshll.u32 %v1817_v42, 16  ;;  %v485_v48 = vor.u32 %v484_v39, %v408_v38  ;;  %v341_v49 = vshll.u32 %v1812_v40, 16 }
  0x21   : > { %v510_v41 = vsel %vm1739_vm2, %v463_v37, 0  ;;  %v348_v52 = vshll.u32 %v1820_v43, 16  ;;  %v338_v56 = vshrl.u32 %v1812_v40, 16  ;;  %v345_v60 = vshrl.u32 %v1820_v43, 16 }
  0x22   : > { %v486_v51 = vrot.slane %v418_v45, 1  ;;  %v521_v55 = vsel %vm1739_vm2, %v485_v48, 0  ;;  %v464_v57 = vrot.slane %v341_v49, 1  ;;  %v390_v8 = vshll.u32 %v1850_v58, 16  ;;  %v1480_v48 = vld [vmem:[%s2408_s1 + $0x10] sm:$0xf] }
  0x23   : > { %v466_v61 = vrot.slane %v348_v52, 1  ;;  %v387_v13 = vshrl.u32 %v1850_v58, 16  ;;  %v312_v23 = vrot.slane %v310_v6, 7  ;;  %v1520_v6 = vld [vmem:[%s2408_s1 + $0x8] sm:$0x30]  ;;  %v362_v35 = vshll.u32 %v1893_v27, 16 }
  0x24   : > { %v487_v54 = vor.u32 %v486_v51, %v415_v44  ;;  %v465_v63 = vor.u32 %v464_v57, %v338_v56  ;;  %v478_v14 = vrot.slane %v390_v8, 1 }
  0x25   : > { %v467_v10 = vor.u32 %v466_v61, %v345_v60  ;;  %v315_v25 = vor.u32 %v313_v7, %v312_v23  ;;  %v470_v1 = vrot.slane %v362_v35, 1 }
  0x26   : > { %v522_v59 = vsel %vm1739_vm2, %v487_v54, 0  ;;  %v511_v11 = vsel %vm1739_vm2, %v465_v63, 0  ;;  %v479_v18 = vor.u32 %v478_v14, %v387_v13  ;;  %v369_v54 = vshll.u32 %v1917_v47, 16 }
  0x27   : > { %595 = vrot.lane.b32.xlu1 %v519_v24, %s1636_s7  ;;  %v512_v16 = vsel %vm1739_vm2, %v467_v10, 0  ;;  %v1888_v24 = vld [vmem:[%s1717_s5 + $0x30] sm:$0xff] }
  0x28   : > { %527 = vrot.lane.b32.xlu0 %v1758_v17, %s1635_s6  ;;  %575 = vrot.lane.b32.xlu2 %v509_v29, %s1636_s7  ;;  %v518_v19 = vsel %vm1739_vm2, %v479_v18, 0  ;;  %v1439_v29 = vld [vmem:[%s2408_s1 + $0x8] sm:$0xf]  ;;  %v355_v46 = vshll.u32 %v1888_v24, 16  ;;  %v440_v18 = vsel %vm1945_vm6, 0, %v315_v25  ;;  %v1963_v25 = vld [vmem:[%s1717_s5 + $0x50] sm:$0xff] }
  0x29   : > { %v1440_v30 = vor.u32 %v1520_v6, %v1439_v29  ;;  %v1954_v6 = vld [vmem:[%s1717_s5 + $0x48] sm:$0xff] }
  0x2a   : > { %v468_v51 = vrot.slane %v355_v46, 1 }
  0x2b   : > { %v730_v37 = vsel %vm728_vm3, %v1440_v30, 0  ;;  %v319_v30 = vrot.slane %v317_v3, 7 }
  0x2c   : > { %739 = vmatpush.bf16.msra.mxu0 %v730_v37  ;;  %1523 = vmatpush.bf16.msra.mxu3 %v730_v37 }
  0x2d   : > { %v322_v37 = vor.u32 %v320_v4, %v319_v30 }
  0x2f   : > { %549 = vrot.lane.b32.xlu1 %v1753_v15, %s1635_s6  ;;  %v441_v3 = vsel %vm1945_vm6, 0, %v322_v37 }
  0x30   : > { %597 = vrot.lane.b32.xlu0 %v520_v33, %s1636_s7  ;;  %551 = vrot.lane.b32.xlu2 %v1793_v32, %s1635_s6  ;;  %v359_v33 = vshrl.u32 %v1893_v27, 16 }
  0x31   : > { %1524 = vmatpush.bf16.msrb.mxu3 %v830_v53  ;;  %v366_v53 = vshrl.u32 %v1917_v47, 16 }
  0x32   : > { %v471_v7 = vor.u32 %v470_v1, %v359_v33  ;;  %v383_v1 = vshll.u32 %v1963_v25, 16 }
  0x34   : > { %v514_v39 = vsel %vm1739_vm2, %v471_v7, 0 }
  0x37   : > { %529 = vrot.lane.b32.xlu1 %v1781_v28, %s1635_s6 }
  0x38   : > { %577 = vrot.lane.b32.xlu0 %v510_v41, %s1636_s7  ;;  %531 = vrot.lane.b32.xlu2 %v1812_v40, %s1635_s6  ;;  %v352_v41 = vshrl.u32 %v1888_v24, 16 }
  0x3a   : > { %v469_v57 = vor.u32 %v468_v51, %v352_v41 }
  0x3c   : > { %v513_v63 = vsel %vm1739_vm2, %v469_v57, 0 }
  0x3f   : > { %599 = vrot.lane.b32.xlu1 %v521_v55, %s1636_s7  ;;  %v1481_v55 = vor.u32 %v1521_v50, %v1480_v48  ;;  %v476_v48 = vrot.slane %v383_v1, 1  ;;  %v396_v50 = vrot.slane %v394_v12, 7  ;;  %v326_v12 = vrot.slane %v324_v20, 7 }
  0x40   : > { %553 = vrot.lane.b32.xlu0 %v1817_v42, %s1635_s6  ;;  %601 = vrot.lane.b32.xlu2 %v522_v59, %s1636_s7  ;;  %v472_v59 = vrot.slane %v369_v54, 1 }
  0x41   : > { %v930_v61 = vsel %vm728_vm3, %v1481_v55, 0  ;;  %v399_v55 = vor.u32 %v397_v5, %v396_v50  ;;  %v333_v50 = vrot.slane %v331_v34, 7  ;;  %v410_v34 = vrot.slane %v408_v38, 7 }
  0x42   : > { %v473_v10 = vor.u32 %v472_v59, %v366_v53  ;;  %939 = vmatpush.bf16.msra.mxu2 %v930_v61  ;;  %v376_v59 = vshll.u32 %v1954_v6, 16 }
  0x43   : > { %v452_v5 = vsel %vm1945_vm6, 0, %v399_v55  ;;  %v336_v15 = vor.u32 %v334_v31, %v333_v50  ;;  %v413_v28 = vor.u32 %v411_v36, %v410_v34  ;;  %v361_v34 = vrot.slane %v359_v33, 7 }
  0x44   : > { %v474_v2 = vrot.slane %v376_v59, 1 }
  0x45   : > { %v454_v38 = vsel %vm1945_vm6, 0, %v413_v28 }
  0x47   : > { %579 = vrot.lane.b32.xlu1 %v511_v11, %s1636_s7  ;;  %v515_v11 = vsel %vm1739_vm2, %v473_v10, 0 }
  0x48   : > { %533 = vrot.lane.b32.xlu0 %v1820_v43, %s1635_s6  ;;  %581 = vrot.lane.b32.xlu2 %v512_v16, %s1636_s7 }
  0x4f   : > { %545 = vrot.lane.b32.xlu1 %v1850_v58, %s1635_s6 }
  0x50   : > { %593 = vrot.lane.b32.xlu0 %v518_v19, %s1636_s7  ;;  %583 = vrot.lane.b32.xlu2 %v513_v63, %s1636_s7 }
  0x57   : > { %535 = vrot.lane.b32.xlu1 %v1888_v24, %s1635_s6  ;;  %v364_v24 = vor.u32 %v362_v35, %v361_v34 }
  0x58   : > { %537 = vrot.lane.b32.xlu0 %v1893_v27, %s1635_s6  ;;  %539 = vrot.lane.b32.xlu2 %v1917_v47, %s1635_s6 }
  0x5f   : > { %585 = vrot.lane.b32.xlu1 %v514_v39, %s1636_s7  ;;  %v380_v39 = vshrl.u32 %v1963_v25, 16 }
  0x60   : > { %587 = vrot.lane.b32.xlu0 %v515_v11, %s1636_s7  ;;  %v373_v11 = vshrl.u32 %v1954_v6, 16 }
  0x61   : > { %v477_v0 = vor.u32 %v476_v48, %v380_v39 }
  0x62   : > { %v475_v20 = vor.u32 %v474_v2, %v373_v11 }
  0x63   : > { %v517_v51 = vsel %vm1739_vm2, %v477_v0, 0 }
  0x67   : > { %541 = vrot.lane.b32.xlu1 %v1954_v6, %s1635_s6  ;;  %v382_v6 = vrot.slane %v380_v39, 7  ;;  %v2164_v39 = vld [vmem:[%s2410_s3] ss:$0 sm:$0xff] }
  0x68   : > { %543 = vrot.lane.b32.xlu0 %v1963_v25, %s1635_s6 }
  0x6f   : > { %591 = vrot.lane.b32.xlu1 %v517_v51, %s1636_s7  ;;  %v443_v51 = vsel %vm1945_vm6, 0, %v336_v15 }
  0x72   : > { %v524_v16 = vpop.permute.xlu2 %523 }
  0x73   : > { %v606_v19 = vsel %vm603_vm7, %v440_v18, %v524_v16  ;;  %v329_v16 = vor.u32 %v327_v21, %v326_v12 }
  0x75   : > { %v442_v37 = vsel %vm1945_vm6, 0, %v329_v16 }
  0x7a   : > { %v572_v23 = vpop.permute.xlu2 %571 }
  0x7b   : > { %v654_v29 = vsel %vm652_vm8, %v606_v19, %v572_v23  ;;  %v516_v19 = vsel %vm1739_vm2, %v475_v20, 0 }
  0x7c   : > { %1441 = vmatmul.msk.bf16.vlgmr.msra.gmra.mxu0 %vm695_vm9, %v654_v29  ;;  %1461 = vmatmul.msk.bf16.gmra.mxu1 %vm695_vm9, %v654_v29  ;;  %v403_v29 = vrot.slane %v401_v26, 7 }
  0x7d   : > { %589 = vrot.lane.b32.xlu2 %v516_v19, %s1636_s7 }
  0x7e   : > { %v406_v21 = vor.u32 %v404_v22, %v403_v29 }
  0x82   : > { %v576_v17 = vpop.permute.xlu2 %575 }
  0x8a   : > { %v526_v7 = vpop.permute.xlu0 %525  ;;  %v552_v31 = vpop.permute.xlu2 %551 }
  0x8b   : > { %v609_v4 = vsel %vm603_vm7, %v441_v3, %v526_v7  ;;  %v453_v3 = vsel %vm1945_vm6, 0, %v406_v21  ;;  %v648_v2 = vsel %vm603_vm7, %v454_v38, %v552_v31  ;;  %v368_v31 = vrot.slane %v366_v53, 7 }
  0x8d   : > { %v371_v27 = vor.u32 %v369_v54, %v368_v31 }
  0x8f   : > { %v448_v35 = vsel %vm1945_vm6, 0, %v371_v27 }
  0x91   : > { %v574_v57 = vpop.permute.xlu1 %573 }
  0x92   : > { %v656_v63 = vsel %vm652_vm8, %v609_v4, %v574_v57  ;;  %v548_v10 = vpop.permute.xlu0 %547 }
  0x93   : > { %1442 = vmatmul.msk.bf16.gmra.mxu0 %vm695_vm9, %v656_v63  ;;  %1462 = vmatmul.msk.bf16.gmra.mxu1 %vm695_vm9, %v656_v63  ;;  %v642_v18 = vsel %vm603_vm7, %v452_v5, %v548_v10  ;;  %v532_v5 = vpop.permute.xlu2 %531 }
  0x94   : > { %1482 = vmatmul.msk.bf16.vlgmr.msra.gmra.mxu2 %vm695_vm9, %v656_v63  ;;  %v340_v63 = vrot.slane %v338_v56, 7  ;;  %v417_v56 = vrot.slane %v415_v44, 7 }
  0x96   : > { %v343_v32 = vor.u32 %v341_v49, %v340_v63  ;;  %v420_v40 = vor.u32 %v418_v45, %v417_v56 }
  0x98   : > { %v444_v20 = vsel %vm1945_vm6, 0, %v343_v32  ;;  %v455_v44 = vsel %vm1945_vm6, 0, %v420_v40 }
  0x99   : > { %v596_v23 = vpop.permute.xlu1 %595  ;;  %v618_v16 = vsel %vm603_vm7, %v444_v20, %v532_v5  ;;  %v375_v5 = vrot.slane %v373_v11, 7 }
  0x9a   : > { %v2008_v30 = vsel %vm652_vm8, %v642_v18, %v596_v23  ;;  %v528_v7 = vpop.permute.xlu0 %527  ;;  %v347_v23 = vrot.slane %v345_v60, 7  ;;  %v389_v60 = vrot.slane %v387_v13, 7 }
  0x9b   : > { %1453 = vmatmul.msk.bf16.vlgmr.msra.gmra.mxu3 %vm695_vm9, %v2008_v30  ;;  %v612_v9 = vsel %vm603_vm7, %v442_v37, %v528_v7  ;;  %v602_v29 = vpop.permute.xlu2 %601  ;;  %v378_v56 = vor.u32 %v376_v59, %v375_v5 }
  0x9c   : > { %1525 = vmatpush.bf16.msra.mxu3 %v930_v61  ;;  %v658_v48 = vsel %vm652_vm8, %v612_v9, %v576_v17  ;;  %v350_v42 = vor.u32 %v348_v52, %v347_v23  ;;  %v392_v43 = vor.u32 %v390_v8, %v389_v60  ;;  %v2157_v23 = vld [vmem:[%s2409_s2] ss:$0 sm:$0xff] }
  0x9d   : > { %v449_v20 = vsel %vm1945_vm6, 0, %v378_v56 }
  0x9e   : > { %v445_v7 = vsel %vm1945_vm6, 0, %v350_v42  ;;  %v451_v13 = vsel %vm1945_vm6, 0, %v392_v43 }
  0xa1   : > { %v550_v26 = vpop.permute.xlu1 %549 }
  0xa2   : > { %v598_v61 = vpop.permute.xlu0 %597  ;;  %v645_v0 = vsel %vm603_vm7, %v453_v3, %v550_v26  ;;  %v354_v26 = vrot.slane %v352_v41, 7 }
  0xa3   : > { %1443 = vmatmul.msk.bf16.gmra.mxu0 %vm695_vm9, %v658_v48  ;;  %1463 = vmatmul.msk.bf16.gmra.mxu1 %vm695_vm9, %v658_v48  ;;  %v2029_v22 = vsel %vm652_vm8, %v645_v0, %v598_v61  ;;  %v582_v21 = vpop.permute.xlu2 %581 }
  0xa4   : > { %1483 = vmatmul.msk.bf16.gmra.mxu2 %vm695_vm9, %v658_v48  ;;  %v357_v58 = vor.u32 %v355_v46, %v354_v26  ;;  %v841_v46 = vpop.f32.mrf.mxu1 }
  0xa6   : > { %v446_v41 = vsel %vm1945_vm6, 0, %v357_v58 }
  0xa9   : > { %v530_v4 = vpop.permute.xlu1 %529 }
  0xaa   : > { %v615_v55 = vsel %vm603_vm7, %v443_v51, %v530_v4  ;;  %v578_v57 = vpop.permute.xlu0 %577  ;;  %v447_v51 = vsel %vm1945_vm6, 0, %v364_v24 }
  0xab   : > { %1454 = vmatmul.msk.bf16.gmra.mxu3 %vm695_vm9, %v2029_v22  ;;  %v660_v12 = vsel %vm652_vm8, %v615_v55, %v578_v57  ;;  %v584_v15 = vpop.permute.xlu2 %583 }
  0xb1   : > { %v600_v10 = vpop.permute.xlu1 %599 }
  0xb2   : > { %v2052_v36 = vsel %vm652_vm8, %v648_v2, %v600_v10  ;;  %v554_v19 = vpop.permute.xlu0 %553 }
  0xb3   : > { %1444 = vmatmul.msk.bf16.gmra.mxu0 %vm695_vm9, %v660_v12  ;;  %1464 = vmatmul.msk.bf16.gmra.mxu1 %vm695_vm9, %v660_v12  ;;  %v651_v37 = vsel %vm603_vm7, %v455_v44, %v554_v19  ;;  %v540_v63 = vpop.permute.xlu2 %539  ;;  %v385_v44 = vor.u32 %v383_v1, %v382_v6 }
  0xb4   : > { %1484 = vmatmul.msk.bf16.gmra.mxu2 %vm695_vm9, %v660_v12  ;;  %v2075_v45 = vsel %vm652_vm8, %v651_v37, %v602_v29  ;;  %v843_v12 = vpop.f32.mrf.mxu1  ;;  %v630_v53 = vsel %vm603_vm7, %v448_v35, %v540_v63 }
  0xb9   : > { %v580_v18 = vpop.permute.xlu1 %579 }
  0xba   : > { %v662_v49 = vsel %vm652_vm8, %v618_v16, %v580_v18  ;;  %v534_v9 = vpop.permute.xlu0 %533 }
  0xbb   : > { %1455 = vmatmul.msk.bf16.gmra.mxu3 %vm695_vm9, %v2052_v36  ;;  %v621_v17 = vsel %vm603_vm7, %v445_v7, %v534_v9  ;;  %v450_v9 = vsel %vm1945_vm6, 0, %v385_v44 }
  0xbc   : > { %v664_v52 = vsel %vm652_vm8, %v621_v17, %v582_v21 }
  0xc1   : > { %v546_v48 = vpop.permute.xlu1 %545 }
  0xc2   : > { %v639_v50 = vsel %vm603_vm7, %v451_v13, %v546_v48  ;;  %v594_v3 = vpop.permute.xlu0 %593 }
  0xc3   : > { %1445 = vmatmul.msk.bf16.gmra.mxu0 %vm695_vm9, %v662_v49  ;;  %1465 = vmatmul.msk.bf16.gmra.mxu1 %vm695_vm9, %v662_v49  ;;  %v2098_v8 = vsel %vm652_vm8, %v639_v50, %v594_v3 }
  0xc4   : > { %1485 = vmatmul.msk.bf16.gmra.mxu2 %vm695_vm9, %v662_v49 }
  0xc9   : > { %v536_v61 = vpop.permute.xlu1 %535 }
  0xca   : > { %v624_v0 = vsel %vm603_vm7, %v446_v41, %v536_v61  ;;  %v538_v55 = vpop.permute.xlu0 %537 }
  0xcb   : > { %1456 = vmatmul.msk.bf16.gmra.mxu3 %vm695_vm9, %v2075_v45  ;;  %v666_v4 = vsel %vm652_vm8, %v624_v0, %v584_v15  ;;  %v627_v57 = vsel %vm603_vm7, %v447_v51, %v538_v55 }
  0xd1   : > { %v586_v33 = vpop.permute.xlu1 %585 }
  0xd2   : > { %v668_v28 = vsel %vm652_vm8, %v627_v57, %v586_v33  ;;  %v588_v2 = vpop.permute.xlu0 %587 }
  0xd3   : > { %1446 = vmatmul.msk.bf16.gmra.mxu0 %vm695_vm9, %v664_v52  ;;  %1466 = vmatmul.msk.bf16.gmra.mxu1 %vm695_vm9, %v664_v52  ;;  %v670_v32 = vsel %vm652_vm8, %v630_v53, %v588_v2 }
  0xd4   : > { %1486 = vmatmul.msk.bf16.gmra.mxu2 %vm695_vm9, %v664_v52 }
  0xd7   : > { %v590_v18 = vpop.permute.xlu2 %589 }
  0xd9   : > { %v542_v16 = vpop.permute.xlu1 %541 }
  0xda   : > { %v633_v11 = vsel %vm603_vm7, %v449_v20, %v542_v16  ;;  %v544_v17 = vpop.permute.xlu0 %543 }
  0xdb   : > { %1472 = vmatmul.msk.bf16.vlgmr.msrb.gmra.mxu3 %vm695_vm9, %v2098_v8  ;;  %v672_v19 = vsel %vm652_vm8, %v633_v11, %v590_v18  ;;  %v636_v1 = vsel %vm603_vm7, %v450_v9, %v544_v17 }
  0xe1   : > { %v592_v21 = vpop.permute.xlu1 %591 }
  0xe2   : > { %v674_v3 = vsel %vm652_vm8, %v636_v1, %v592_v21 }
  0xe3   : > { %1447 = vmatmul.msk.bf16.gmra.mxu0 %vm695_vm9, %v666_v4  ;;  %1467 = vmatmul.msk.bf16.gmra.mxu1 %vm695_vm9, %v666_v4 }
  0xe4   : > { %1487 = vmatmul.msk.bf16.gmra.mxu2 %vm695_vm9, %v666_v4 }
  0xeb   : > { %1473 = vmatmul.msk.bf16.gmra.mxu3 %vm695_vm9, %v2008_v30 }
  0xf3   : > { %1448 = vmatmul.msk.bf16.gmra.mxu0 %vm695_vm9, %v668_v28  ;;  %1468 = vmatmul.msk.bf16.gmra.mxu1 %vm695_vm9, %v668_v28 }
  0xf4   : > { %1488 = vmatmul.msk.bf16.gmra.mxu2 %vm695_vm9, %v668_v28 }
  0xf9   : > { %v741_v38 = vpop.f32.mrf.mxu0  ;;  %v846_v10 = vpop.f32.mrf.mxu1 }
  0xfa   : > { %v842_v59 = vadd.f32 %v841_v46, %v741_v38 }
  0xfb   : > { %1474 = vmatmul.msk.bf16.gmra.mxu3 %vm695_vm9, %v2029_v22 }
 0x101   : > { %v743_v47 = vpop.f32.mrf.mxu0  ;;  %v2137_v54 = vpop.f32.mrf.mxu1 }
 0x102   : > { %v844_v43 = vadd.f32 %v843_v12, %v743_v47 }
 0x103   : > { %1449 = vmatmul.msk.bf16.gmra.mxu0 %vm695_vm9, %v670_v32  ;;  %1469 = vmatmul.msk.bf16.gmra.mxu1 %vm695_vm9, %v670_v32 }
 0x104   : > { %1489 = vmatmul.msk.bf16.gmra.mxu2 %vm695_vm9, %v670_v32 }
 0x10b   : > { %1475 = vmatmul.msk.bf16.gmra.mxu3 %vm695_vm9, %v2052_v36 }
 0x110   : > { %v746_v40 = vpop.f32.mrf.mxu0  ;;  %v2146_v49 = vpop.f32.mrf.mxu1 }
 0x111   : > { %v847_v0 = vadd.f32 %v846_v10, %v746_v40 }
 0x113   : > { %1450 = vmatmul.msk.bf16.gmra.mxu0 %vm695_vm9, %v672_v19  ;;  %1470 = vmatmul.msk.bf16.gmra.mxu1 %vm695_vm9, %v672_v19 }
 0x114   : > { %1490 = vmatmul.msk.bf16.gmra.mxu2 %vm695_vm9, %v672_v19 }
 0x117   : > { %v941_v29 = vpop.f32.mrf.mxu2 }
 0x118   : > { %v1021_v37 = vadd.f32 %v941_v29, %v842_v59  ;;  %v748_v42 = vpop.f32.mrf.mxu0  ;;  %v2166_v60 = vpop.f32.mrf.mxu1 }
 0x119   : > { %v849_v31 = vadd.f32 %v2137_v54, %v748_v42 }
 0x11a   : > { %v1057_v7 = vmul.f32 %v2157_v23, %v1021_v37 }
 0x11b   : > { %1494 = vmatmul.msk.bf16.vlgmr.msra.gmra.mxu3 %vm695_vm9, %v2029_v22 }
 0x11c   : > { %v1093_v25 = vadd.f32 %v2164_v39, %v1057_v7 }
 0x11e   : > { %vm1125_vm10 = vcmp.gt.f32.partialorder %v1093_v25, 0.0  ;;  %v1157_v52 = vmul.f32 0.2, %v1093_v25  ;;  %v2178_v48 = vpop.f32.mrf.mxu3 }
 0x11f   : > { %v943_v26 = vpop.f32.mrf.mxu2 }
 0x120   : > { %v1189_v13 = vsel %vm1125_vm10, %v1093_v25, %v1157_v52  ;;  %v1022_v14 = vadd.f32 %v943_v26, %v844_v43  ;;  %v751_v50 = vpop.f32.mrf.mxu0  ;;  %v856_v41 = vpop.f32.mrf.mxu1 }
 0x121   : > { %v1221_v22 = vpack.c.bf16 %v1189_v13, %v1189_v13  ;;  %v852_v32 = vadd.f32 %v2146_v49, %v751_v50 }
 0x122   : > { %v1058_v58 = vmul.f32 %v2157_v23, %v1022_v14 }
 0x123   : > { %1254 = vst.msk [vmem:[%s2182_s10] sm:$0xf] %vm1253_vm11, %v1221_v22  ;;  %1451 = vmatmul.msk.bf16.gmra.mxu0 %vm695_vm9, %v674_v3  ;;  %1471 = vmatmul.msk.bf16.gmra.mxu1 %vm695_vm9, %v674_v3 }
 0x124   : > { %v1094_v61 = vadd.f32 %v2164_v39, %v1058_v58  ;;  %1491 = vmatmul.msk.bf16.gmra.mxu2 %vm695_vm9, %v674_v3 }
 0x126   : > { %vm1126_vm12 = vcmp.gt.f32.partialorder %v1094_v61, 0.0  ;;  %v1158_v15 = vmul.f32 0.2, %v1094_v61  ;;  %v2190_v4 = vpop.f32.mrf.mxu3 }
 0x127   : > { %v946_v34 = vpop.f32.mrf.mxu2 }
 0x128   : > { %v1190_v24 = vsel %vm1126_vm12, %v1094_v61, %v1158_v15  ;;  %v1023_v46 = vadd.f32 %v946_v34, %v847_v0  ;;  %v753_v51 = vpop.f32.mrf.mxu0  ;;  %v858_v28 = vpop.f32.mrf.mxu1 }
 0x129   : > { %v1222_v55 = vpack.c.bf16 %v1190_v24, %v1190_v24  ;;  %v854_v49 = vadd.f32 %v2166_v60, %v753_v51 }
 0x12a   : > { %v1059_v57 = vmul.f32 %v2157_v23, %v1023_v46 }
 0x12b   : > { %1255 = vst.msk [vmem:[%s2182_s10 + $0x4] sm:$0xf] %vm1253_vm11, %v1222_v55  ;;  %1495 = vmatmul.msk.bf16.gmra.mxu3 %vm695_vm9, %v2052_v36 }
 0x12c   : > { %v1095_v33 = vadd.f32 %v2164_v39, %v1059_v57 }
 0x12e   : > { %vm1127_vm13 = vcmp.gt.f32.partialorder %v1095_v33, 0.0  ;;  %v1159_v12 = vmul.f32 0.2, %v1095_v33  ;;  %v2199_v27 = vpop.f32.mrf.mxu3 }
 0x12f   : > { %v948_v35 = vpop.f32.mrf.mxu2 }
 0x130   : > { %v1191_v63 = vsel %vm1127_vm13, %v1095_v33, %v1159_v12  ;;  %v1024_v38 = vadd.f32 %v948_v35, %v849_v31  ;;  %v756_v10 = vpop.f32.mrf.mxu0  ;;  %v861_v54 = vpop.f32.mrf.mxu1 }
 0x131   : > { %v1223_v53 = vpack.c.bf16 %v1191_v63, %v1191_v63  ;;  %v857_v60 = vadd.f32 %v856_v41, %v756_v10 }
 0x132   : > { %v1060_v2 = vmul.f32 %v2157_v23, %v1024_v38 }
 0x133   : > { %1256 = vst.msk [vmem:[%s2182_s10 + $0x8] sm:$0xf] %vm1253_vm11, %v1223_v53  ;;  %1452 = vmatmul.msk.bf16.gmra.mxu0 %vm695_vm9, %v2098_v8 }
 0x134   : > { %v1096_v36 = vadd.f32 %v2164_v39, %v1060_v2  ;;  %1492 = vmatmul.msk.bf16.gmra.mxu2 %vm695_vm9, %v2098_v8 }
 0x136   : > { %vm1128_vm14 = vcmp.gt.f32.partialorder %v1096_v36, 0.0  ;;  %v1160_v5 = vmul.f32 0.2, %v1096_v36  ;;  %v2210_v47 = vpop.f32.mrf.mxu3 }
 0x137   : > { %v951_v56 = vpop.f32.mrf.mxu2 }
 0x138   : > { %v1192_v20 = vsel %vm1128_vm14, %v1096_v36, %v1160_v5  ;;  %v1025_v16 = vadd.f32 %v951_v56, %v852_v32  ;;  %v758_v11 = vpop.f32.mrf.mxu0  ;;  %v863_v7 = vpop.f32.mrf.mxu1 }
 0x139   : > { %v1224_v18 = vpack.c.bf16 %v1192_v20, %v1192_v20  ;;  %v859_v50 = vadd.f32 %v858_v28, %v758_v11 }
 0x13a   : > { %v1061_v40 = vmul.f32 %v2157_v23, %v1025_v16 }
 0x13b   : > { %1257 = vst.msk [vmem:[%s2182_s10 + $0xc] sm:$0xf] %vm1253_vm11, %v1224_v18  ;;  %1496 = vmatmul.msk.bf16.gmra.mxu3 %vm695_vm9, %v2075_v45 }
 0x13c   : > { %v1097_v8 = vadd.f32 %v2164_v39, %v1061_v40 }
 0x13e   : > { %vm1129_vm15 = vcmp.gt.f32.partialorder %v1097_v8, 0.0  ;;  %v1161_v19 = vmul.f32 0.2, %v1097_v8  ;;  %v2219_v6 = vpop.f32.mrf.mxu3 }
 0x13f   : > { %v953_v59 = vpop.f32.mrf.mxu2 }
 0x140   : > { %v1193_v44 = vsel %vm1129_vm15, %v1097_v8, %v1161_v19  ;;  %v1026_v29 = vadd.f32 %v953_v59, %v854_v49  ;;  %v761_v37 = vpop.f32.mrf.mxu0  ;;  %v866_v14 = vpop.f32.mrf.mxu1 }
 0x141   : > { %v1225_v42 = vpack.c.bf16 %v1193_v44, %v1193_v44  ;;  %v862_v46 = vadd.f32 %v861_v54, %v761_v37 }
 0x142   : > { %v1062_v9 = vmul.f32 %v2157_v23, %v1026_v29 }
 0x143   : > { %1258 = vst.msk [vmem:[%s2182_s10 + $0x10] sm:$0xf] %vm1253_vm11, %v1225_v42 }
 0x144   : > { %v1098_v45 = vadd.f32 %v2164_v39, %v1062_v9  ;;  %1493 = vmatmul.msk.bf16.gmra.mxu2 %vm695_vm9, %v2008_v30 }
 0x146   : > { %vm1130_vm0 = vcmp.gt.f32.partialorder %v1098_v45, 0.0  ;;  %v1162_v17 = vmul.f32 0.2, %v1098_v45  ;;  %v2227_v25 = vpop.f32.mrf.mxu3 }
 0x147   : > { %v956_v1 = vpop.f32.mrf.mxu2 }
 0x148   : > { %v1194_v21 = vsel %vm1130_vm0, %v1098_v45, %v1162_v17  ;;  %v1027_v43 = vadd.f32 %v956_v1, %v857_v60  ;;  %v763_v52 = vpop.f32.mrf.mxu0 }
 0x149   : > { %v1226_v26 = vpack.c.bf16 %v1194_v21, %v1194_v21  ;;  %v864_v38 = vadd.f32 %v863_v7, %v763_v52 }
 0x14a   : > { %v1063_v13 = vmul.f32 %v2157_v23, %v1027_v43 }
 0x14b   : > { %1259 = vst.msk [vmem:[%s2182_s10 + $0x14] sm:$0xf] %vm1253_vm11, %v1226_v26  ;;  %1015 = vmatmul.bf16.gmra.mxu3 %v1637_v62  ;;  %v868_v62 = vpop.f32.mrf.mxu1 }
 0x14c   : > { %v1099_v30 = vadd.f32 %v2164_v39, %v1063_v13 }
 0x14e   : > { %vm1131_vm1 = vcmp.gt.f32.partialorder %v1099_v30, 0.0  ;;  %v1163_v3 = vmul.f32 0.2, %v1099_v30  ;;  %v2234_v22 = vpop.f32.mrf.mxu3 }
 0x14f   : > { %v958_v58 = vpop.f32.mrf.mxu2 }
 0x150   : > { %v1195_v41 = vsel %vm1131_vm1, %v1099_v30, %v1163_v3  ;;  %v1028_v61 = vadd.f32 %v958_v58, %v859_v50  ;;  %v766_v0 = vpop.f32.mrf.mxu0 }
 0x151   : > { %v1227_v15 = vpack.c.bf16 %v1195_v41, %v1195_v41  ;;  %v867_v11 = vadd.f32 %v866_v14, %v766_v0 }
 0x152   : > { %v1064_v34 = vmul.f32 %v2157_v23, %v1028_v61 }
 0x153   : > { %1260 = vst.msk [vmem:[%s2182_s10 + $0x18] sm:$0xf] %vm1253_vm11, %v1227_v15  ;;  %v871_v2 = vpop.f32.mrf.mxu1 }
 0x154   : > { %v1100_v24 = vadd.f32 %v2164_v39, %v1064_v34 }
 0x156   : > { %vm1132_vm2 = vcmp.gt.f32.partialorder %v1100_v24, 0.0  ;;  %v1164_v51 = vmul.f32 0.2, %v1100_v24  ;;  %v2240_v55 = vpop.f32.mrf.mxu3 }
 0x157   : > { %v961_v57 = vpop.f32.mrf.mxu2 }
 0x158   : > { %v1196_v33 = vsel %vm1132_vm2, %v1100_v24, %v1164_v51  ;;  %v1029_v28 = vadd.f32 %v961_v57, %v862_v46  ;;  %v768_v31 = vpop.f32.mrf.mxu0 }
 0x159   : > { %v1228_v12 = vpack.c.bf16 %v1196_v33, %v1196_v33  ;;  %v869_v7 = vadd.f32 %v868_v62, %v768_v31 }
 0x15a   : > { %v1065_v35 = vmul.f32 %v2157_v23, %v1029_v28 }
 0x15b   : > { %1261 = vst.msk [vmem:[%s2182_s10 + $0x1c] sm:$0xf] %vm1253_vm11, %v1228_v12  ;;  %v873_v44 = vpop.f32.mrf.mxu1 }
 0x15c   : > { %v1101_v63 = vadd.f32 %v2164_v39, %v1065_v35 }
 0x15e   : > { %vm1133_vm3 = vcmp.gt.f32.partialorder %v1101_v63, 0.0  ;;  %v1165_v10 = vmul.f32 0.2, %v1101_v63  ;;  %v2246_v53 = vpop.f32.mrf.mxu3 }
 0x15f   : > { %v963_v36 = vpop.f32.mrf.mxu2 }
 0x160   : > { %v1197_v32 = vsel %vm1133_vm3, %v1101_v63, %v1165_v10  ;;  %v1030_v5 = vadd.f32 %v963_v36, %v864_v38  ;;  %v771_v54 = vpop.f32.mrf.mxu0 }
 0x161   : > { %v1229_v56 = vpack.c.bf16 %v1197_v32, %v1197_v32  ;;  %v872_v14 = vadd.f32 %v871_v2, %v771_v54 }
 0x162   : > { %v1066_v20 = vmul.f32 %v2157_v23, %v1030_v5 }
 0x163   : > { %1262 = vst.msk [vmem:[%s2182_s10 + $0x20] sm:$0xf] %vm1253_vm11, %v1229_v56  ;;  %v876_v26 = vpop.f32.mrf.mxu1 }
 0x164   : > { %v1102_v16 = vadd.f32 %v2164_v39, %v1066_v20 }
 0x166   : > { %vm1134_vm4 = vcmp.gt.f32.partialorder %v1102_v16, 0.0  ;;  %v1166_v18 = vmul.f32 0.2, %v1102_v16  ;;  %v2252_v40 = vpop.f32.mrf.mxu3 }
 0x167   : > { %v966_v8 = vpop.f32.mrf.mxu2 }
 0x168   : > { %v1198_v49 = vsel %vm1134_vm4, %v1102_v16, %v1166_v18  ;;  %v1031_v19 = vadd.f32 %v966_v8, %v867_v11  ;;  %v773_v59 = vpop.f32.mrf.mxu0 }
 0x169   : > { %v1230_v29 = vpack.c.bf16 %v1198_v49, %v1198_v49  ;;  %v874_v62 = vadd.f32 %v873_v44, %v773_v59 }
 0x16a   : > { %v1067_v37 = vmul.f32 %v2157_v23, %v1031_v19 }
 0x16b   : > { %1263 = vst.msk [vmem:[%s2182_s10 + $0x24] sm:$0xf] %vm1253_vm11, %v1230_v29  ;;  %v878_v24 = vpop.f32.mrf.mxu1 }
 0x16c   : > { %v1103_v42 = vadd.f32 %v2164_v39, %v1067_v37 }
 0x16e   : > { %vm1135_vm5 = vcmp.gt.f32.partialorder %v1103_v42, 0.0  ;;  %v1167_v9 = vmul.f32 0.2, %v1103_v42  ;;  %v2258_v45 = vpop.f32.mrf.mxu3 }
 0x16f   : > { %v968_v60 = vpop.f32.mrf.mxu2 }
 0x170   : > { %v1199_v17 = vsel %vm1135_vm5, %v1103_v42, %v1167_v9  ;;  %v1032_v1 = vadd.f32 %v968_v60, %v869_v7  ;;  %v776_v43 = vpop.f32.mrf.mxu0 }
 0x171   : > { %v1231_v21 = vpack.c.bf16 %v1199_v17, %v1199_v17  ;;  %v877_v38 = vadd.f32 %v876_v26, %v776_v43 }
 0x172   : > { %v1068_v52 = vmul.f32 %v2157_v23, %v1032_v1 }
 0x173   : > { %1264 = vst.msk [vmem:[%s2182_s10 + $0x28] sm:$0xf] %vm1253_vm11, %v1231_v21  ;;  %v881_v36 = vpop.f32.mrf.mxu1 }
 0x174   : > { %v1104_v13 = vadd.f32 %v2164_v39, %v1068_v52 }
 0x176   : > { %vm1136_vm6 = vcmp.gt.f32.partialorder %v1104_v13, 0.0  ;;  %v1168_v30 = vmul.f32 0.2, %v1104_v13  ;;  %v2264_v50 = vpop.f32.mrf.mxu3 }
 0x177   : > { %v971_v3 = vpop.f32.mrf.mxu2 }
 0x178   : > { %v1200_v58 = vsel %vm1136_vm6, %v1104_v13, %v1168_v30  ;;  %v1033_v41 = vadd.f32 %v971_v3, %v872_v14  ;;  %v778_v15 = vpop.f32.mrf.mxu0  ;;  %v902_v3 = vadd.f32 %v2246_v53, %v2178_v48  ;;  %v904_v53 = vadd.f32 %v2252_v40, %v2190_v4 }
 0x179   : > { %v1232_v61 = vpack.c.bf16 %v1200_v58, %v1200_v58  ;;  %v879_v11 = vadd.f32 %v878_v24, %v778_v15 }
 0x17a   : > { %v1069_v0 = vmul.f32 %v2157_v23, %v1033_v41 }
 0x17b   : > { %1265 = vst.msk [vmem:[%s2182_s10 + $0x2c] sm:$0xf] %vm1253_vm11, %v1232_v61  ;;  %v883_v29 = vpop.f32.mrf.mxu1 }
 0x17c   : > { %v1105_v34 = vadd.f32 %v2164_v39, %v1069_v0 }
 0x17e   : > { %vm1137_vm7 = vcmp.gt.f32.partialorder %v1105_v34, 0.0  ;;  %v1169_v46 = vmul.f32 0.2, %v1105_v34  ;;  %v2270_v51 = vpop.f32.mrf.mxu3 }
 0x17f   : > { %v973_v57 = vpop.f32.mrf.mxu2 }
 0x180   : > { %v1201_v33 = vsel %vm1137_vm7, %v1105_v34, %v1169_v46  ;;  %v1034_v28 = vadd.f32 %v973_v57, %v874_v62  ;;  %v781_v63 = vpop.f32.mrf.mxu0 }
 0x181   : > { %v1233_v31 = vpack.c.bf16 %v1201_v33, %v1201_v33  ;;  %v882_v9 = vadd.f32 %v881_v36, %v781_v63 }
 0x182   : > { %v1070_v12 = vmul.f32 %v2157_v23, %v1034_v28 }
 0x183   : > { %1266 = vst.msk [vmem:[%s2182_s10 + $0x30] sm:$0xf] %vm1253_vm11, %v1233_v31  ;;  %v886_v14 = vpop.f32.mrf.mxu1 }
 0x184   : > { %v1106_v35 = vadd.f32 %v2164_v39, %v1070_v12 }
 0x186   : > { %vm1138_vm8 = vcmp.gt.f32.partialorder %v1106_v35, 0.0  ;;  %v1170_v10 = vmul.f32 0.2, %v1106_v35  ;;  %v2276_v2 = vpop.f32.mrf.mxu3 }
 0x187   : > { %v976_v32 = vpop.f32.mrf.mxu2 }
 0x188   : > { %v1202_v5 = vsel %vm1138_vm8, %v1106_v35, %v1170_v10  ;;  %v1035_v54 = vadd.f32 %v976_v32, %v877_v38  ;;  %v783_v49 = vpop.f32.mrf.mxu0 }
 0x189   : > { %v1234_v56 = vpack.c.bf16 %v1202_v5, %v1202_v5  ;;  %v884_v58 = vadd.f32 %v883_v29, %v783_v49 }
 0x18a   : > { %v1071_v20 = vmul.f32 %v2157_v23, %v1035_v54 }
 0x18b   : > { %1267 = vst.msk [vmem:[%s2182_s10 + $0x34] sm:$0xf] %vm1253_vm11, %v1234_v56  ;;  %v888_v31 = vpop.f32.mrf.mxu1 }
 0x18c   : > { %v1107_v16 = vadd.f32 %v2164_v39, %v1071_v20 }
 0x18e   : > { %vm1139_vm9 = vcmp.gt.f32.partialorder %v1107_v16, 0.0  ;;  %v1171_v18 = vmul.f32 0.2, %v1107_v16  ;;  %v2282_v8 = vpop.f32.mrf.mxu3 }
 0x18f   : > { %v978_v19 = vpop.f32.mrf.mxu2 }
 0x190   : > { %v1203_v59 = vsel %vm1139_vm9, %v1107_v16, %v1171_v18  ;;  %v1036_v44 = vadd.f32 %v978_v19, %v879_v11  ;;  %v786_v26 = vpop.f32.mrf.mxu0  ;;  %v907_v18 = vadd.f32 %v2258_v45, %v2199_v27 }
 0x191   : > { %v1235_v37 = vpack.c.bf16 %v1203_v59, %v1203_v59  ;;  %v887_v35 = vadd.f32 %v886_v14, %v786_v26 }
 0x192   : > { %v1072_v42 = vmul.f32 %v2157_v23, %v1036_v44 }
 0x193   : > { %1268 = vst.msk [vmem:[%s2182_s10 + $0x38] sm:$0xf] %vm1253_vm11, %v1235_v37  ;;  %v891_v37 = vpop.f32.mrf.mxu1 }
 0x194   : > { %v1108_v7 = vadd.f32 %v2164_v39, %v1072_v42 }
 0x196   : > { %vm1140_vm10 = vcmp.gt.f32.partialorder %v1108_v7, 0.0  ;;  %v1172_v60 = vmul.f32 0.2, %v1108_v7  ;;  %v2288_v17 = vpop.f32.mrf.mxu3 }
 0x197   : > { %v981_v1 = vpop.f32.mrf.mxu2 }
 0x198   : > { %v1204_v21 = vsel %vm1140_vm10, %v1108_v7, %v1172_v60  ;;  %v1037_v43 = vadd.f32 %v981_v1, %v882_v9  ;;  %v788_v33 = vpop.f32.mrf.mxu0 }
 0x199   : > { %v1236_v52 = vpack.c.bf16 %v1204_v21, %v1204_v21  ;;  %v889_v59 = vadd.f32 %v888_v31, %v788_v33 }
 0x19a   : > { %v1073_v13 = vmul.f32 %v2157_v23, %v1037_v43 }
 0x19b   : > { %1269 = vst.msk [vmem:[%s2182_s10 + $0x3c] sm:$0xf] %vm1253_vm11, %v1236_v52 }
 0x19c   : > { %v1109_v30 = vadd.f32 %v2164_v39, %v1073_v13  ;;  %v909_v13 = vadd.f32 %v2264_v50, %v2210_v47 }
 0x19e   : > { %vm1141_vm12 = vcmp.gt.f32.partialorder %v1109_v30, 0.0  ;;  %v1173_v41 = vmul.f32 0.2, %v1109_v30  ;;  %v1001_v61 = vpop.f32.mrf.mxu3 }
 0x19f   : > { %v983_v0 = vpop.f32.mrf.mxu2  ;;  %v1045_v15 = vadd.f32 %v1001_v61, %v902_v3 }
 0x1a0   : > { %v1205_v34 = vsel %vm1141_vm12, %v1109_v30, %v1173_v41  ;;  %v1038_v24 = vadd.f32 %v983_v0, %v884_v58  ;;  %v791_v49 = vpop.f32.mrf.mxu0 }
 0x1a1   : > { %v1237_v62 = vpack.c.bf16 %v1205_v34, %v1205_v34  ;;  %v1081_v46 = vmul.f32 %v2157_v23, %v1045_v15  ;;  %v892_v30 = vadd.f32 %v891_v37, %v791_v49 }
 0x1a2   : > { %v1074_v57 = vmul.f32 %v2157_v23, %v1038_v24 }
 0x1a3   : > { %1270 = vst.msk [vmem:[%s2182_s10 + $0x40] sm:$0xf] %vm1253_vm11, %v1237_v62  ;;  %v1117_v28 = vadd.f32 %v2164_v39, %v1081_v46  ;;  %v893_v46 = vpop.f32.mrf.mxu1 }
 0x1a4   : > { %v1110_v48 = vadd.f32 %v2164_v39, %v1074_v57 }
 0x1a5   : > { %vm1149_vm13 = vcmp.gt.f32.partialorder %v1117_v28, 0.0  ;;  %v1181_v12 = vmul.f32 0.2, %v1117_v28 }
 0x1a6   : > { %vm1142_vm14 = vcmp.gt.f32.partialorder %v1110_v48, 0.0  ;;  %v1174_v63 = vmul.f32 0.2, %v1110_v48  ;;  %v1003_v38 = vpop.f32.mrf.mxu3 }
 0x1a7   : > { %v1213_v10 = vsel %vm1149_vm13, %v1117_v28, %v1181_v12  ;;  %v986_v36 = vpop.f32.mrf.mxu2  ;;  %v1046_v32 = vadd.f32 %v1003_v38, %v904_v53 }
 0x1a8   : > { %v1206_v5 = vsel %vm1142_vm14, %v1110_v48, %v1174_v63  ;;  %v1245_v54 = vpack.c.bf16 %v1213_v10, %v1213_v10  ;;  %v1039_v56 = vadd.f32 %v986_v36, %v887_v35  ;;  %v793_v41 = vpop.f32.mrf.mxu0  ;;  %v912_v48 = vadd.f32 %v2270_v51, %v2219_v6 }
 0x1a9   : > { %v1238_v20 = vpack.c.bf16 %v1206_v5, %v1206_v5  ;;  %v1082_v16 = vmul.f32 %v2157_v23, %v1046_v32  ;;  %v894_v31 = vadd.f32 %v893_v46, %v793_v41 }
 0x1aa   : > { %1278 = vst.msk [vmem:[%s2182_s10 + $0x60] sm:$0xf] %vm1253_vm11, %v1245_v54  ;;  %v1075_v4 = vmul.f32 %v2157_v23, %v1039_v56 }
 0x1ab   : > { %1271 = vst.msk [vmem:[%s2182_s10 + $0x44] sm:$0xf] %vm1253_vm11, %v1238_v20  ;;  %v1118_v40 = vadd.f32 %v2164_v39, %v1082_v16  ;;  %v896_v51 = vpop.f32.mrf.mxu1 }
 0x1ac   : > { %v1111_v11 = vadd.f32 %v2164_v39, %v1075_v4 }
 0x1ad   : > { %vm1150_vm15 = vcmp.gt.f32.partialorder %v1118_v40, 0.0  ;;  %v1182_v19 = vmul.f32 0.2, %v1118_v40 }
 0x1ae   : > { %vm1143_vm0 = vcmp.gt.f32.partialorder %v1111_v11, 0.0  ;;  %v1175_v44 = vmul.f32 0.2, %v1111_v11  ;;  %v1006_v29 = vpop.f32.mrf.mxu3 }
 0x1af   : > { %v1214_v42 = vsel %vm1150_vm15, %v1118_v40, %v1182_v19  ;;  %v988_v7 = vpop.f32.mrf.mxu2  ;;  %v1047_v9 = vadd.f32 %v1006_v29, %v907_v18  ;;  %v914_v40 = vadd.f32 %v2276_v2, %v2227_v25 }
 0x1b0   : > { %v1207_v60 = vsel %vm1143_vm0, %v1111_v11, %v1175_v44  ;;  %v1246_v1 = vpack.c.bf16 %v1214_v42, %v1214_v42  ;;  %v1040_v21 = vadd.f32 %v988_v7, %v889_v59  ;;  %v796_v54 = vpop.f32.mrf.mxu0 }
 0x1b1   : > { %v1239_v43 = vpack.c.bf16 %v1207_v60, %v1207_v60  ;;  %v1083_v52 = vmul.f32 %v2157_v23, %v1047_v9  ;;  %v897_v18 = vadd.f32 %v896_v51, %v796_v54 }
 0x1b2   : > { %1279 = vst.msk [vmem:[%s2182_s10 + $0x64] sm:$0xf] %vm1253_vm11, %v1246_v1  ;;  %v1076_v27 = vmul.f32 %v2157_v23, %v1040_v21 }
 0x1b3   : > { %1272 = vst.msk [vmem:[%s2182_s10 + $0x48] sm:$0xf] %vm1253_vm11, %v1239_v43  ;;  %v1119_v45 = vadd.f32 %v2164_v39, %v1083_v52  ;;  %v917_v43 = vadd.f32 %v2282_v8, %v2234_v22  ;;  %v898_v52 = vpop.f32.mrf.mxu1 }
 0x1b4   : > { %v1112_v26 = vadd.f32 %v2164_v39, %v1076_v27 }
 0x1b5   : > { %vm1151_vm1 = vcmp.gt.f32.partialorder %v1119_v45, 0.0  ;;  %v1183_v14 = vmul.f32 0.2, %v1119_v45 }
 0x1b6   : > { %vm1144_vm2 = vcmp.gt.f32.partialorder %v1112_v26, 0.0  ;;  %v1176_v3 = vmul.f32 0.2, %v1112_v26  ;;  %v1008_v58 = vpop.f32.mrf.mxu3 }
 0x1b7   : > { %v1215_v61 = vsel %vm1151_vm1, %v1119_v45, %v1183_v14  ;;  %v991_v0 = vpop.f32.mrf.mxu2  ;;  %v1048_v15 = vadd.f32 %v1008_v58, %v909_v13 }
 0x1b8   : > { %v1208_v34 = vsel %vm1144_vm2, %v1112_v26, %v1176_v3  ;;  %v1247_v24 = vpack.c.bf16 %v1215_v61, %v1215_v61  ;;  %v1041_v62 = vadd.f32 %v991_v0, %v892_v30  ;;  %v798_v2 = vpop.f32.mrf.mxu0 }
 0x1b9   : > { %v1240_v57 = vpack.c.bf16 %v1208_v34, %v1208_v34  ;;  %v1084_v33 = vmul.f32 %v2157_v23, %v1048_v15  ;;  %v899_v45 = vadd.f32 %v898_v52, %v798_v2 }
 0x1ba   : > { %1280 = vst.msk [vmem:[%s2182_s10 + $0x68] sm:$0xf] %vm1253_vm11, %v1247_v24  ;;  %v1077_v47 = vmul.f32 %v2157_v23, %v1041_v62  ;;  %v919_v24 = vadd.f32 %v2288_v17, %v2240_v55 }
 0x1bb   : > { %1273 = vst.msk [vmem:[%s2182_s10 + $0x4c] sm:$0xf] %vm1253_vm11, %v1240_v57  ;;  %v1120_v50 = vadd.f32 %v2164_v39, %v1084_v33 }
 0x1bc   : > { %v1113_v28 = vadd.f32 %v2164_v39, %v1077_v47 }
 0x1bd   : > { %vm1152_vm3 = vcmp.gt.f32.partialorder %v1120_v50, 0.0  ;;  %v1184_v53 = vmul.f32 0.2, %v1120_v50 }
 0x1be   : > { %vm1145_vm4 = vcmp.gt.f32.partialorder %v1113_v28, 0.0  ;;  %v1177_v12 = vmul.f32 0.2, %v1113_v28  ;;  %v1011_v35 = vpop.f32.mrf.mxu3 }
 0x1bf   : > { %v1216_v63 = vsel %vm1152_vm3, %v1120_v50, %v1184_v53  ;;  %v993_v38 = vpop.f32.mrf.mxu2  ;;  %v1049_v10 = vadd.f32 %v1011_v35, %v912_v48 }
 0x1c0   : > { %v1209_v36 = vsel %vm1145_vm4, %v1113_v28, %v1177_v12  ;;  %v1248_v32 = vpack.c.bf16 %v1216_v63, %v1216_v63  ;;  %v1042_v5 = vadd.f32 %v993_v38, %v894_v31 }
 0x1c1   : > { %v1241_v56 = vpack.c.bf16 %v1209_v36, %v1209_v36  ;;  %v1085_v20 = vmul.f32 %v2157_v23, %v1049_v10 }
 0x1c2   : > { %1281 = vst.msk [vmem:[%s2182_s10 + $0x6c] sm:$0xf] %vm1253_vm11, %v1248_v32  ;;  %v1078_v6 = vmul.f32 %v2157_v23, %v1042_v5 }
 0x1c3   : > { %1274 = vst.msk [vmem:[%s2182_s10 + $0x50] sm:$0xf] %vm1253_vm11, %v1241_v56  ;;  %v1121_v16 = vadd.f32 %v2164_v39, %v1085_v20 }
 0x1c4   : > { %v1114_v4 = vadd.f32 %v2164_v39, %v1078_v6 }
 0x1c5   : > { %vm1153_vm5 = vcmp.gt.f32.partialorder %v1121_v16, 0.0  ;;  %v1185_v11 = vmul.f32 0.2, %v1121_v16 }
 0x1c6   : > { %vm1146_vm6 = vcmp.gt.f32.partialorder %v1114_v4, 0.0  ;;  %v1178_v49 = vmul.f32 0.2, %v1114_v4  ;;  %v1013_v19 = vpop.f32.mrf.mxu3 }
 0x1c7   : > { %v1217_v59 = vsel %vm1153_vm5, %v1121_v16, %v1185_v11  ;;  %v996_v44 = vpop.f32.mrf.mxu2  ;;  %v1050_v29 = vadd.f32 %v1013_v19, %v914_v40 }
 0x1c8   : > { %v1210_v37 = vsel %vm1146_vm6, %v1114_v4, %v1178_v49  ;;  %v1249_v42 = vpack.c.bf16 %v1217_v59, %v1217_v59  ;;  %v1043_v7 = vadd.f32 %v996_v44, %v897_v18 }
 0x1c9   : > { %v1242_v9 = vpack.c.bf16 %v1210_v37, %v1210_v37  ;;  %v1086_v60 = vmul.f32 %v2157_v23, %v1050_v29 }
 0x1ca   : > { %1282 = vst.msk [vmem:[%s2182_s10 + $0x70] sm:$0xf] %vm1253_vm11, %v1249_v42  ;;  %v1079_v25 = vmul.f32 %v2157_v23, %v1043_v7 }
 0x1cb   : > { %1275 = vst.msk [vmem:[%s2182_s10 + $0x54] sm:$0xf] %vm1253_vm11, %v1242_v9  ;;  %v1122_v1 = vadd.f32 %v2164_v39, %v1086_v60 }
 0x1cc   : > { %v1115_v21 = vadd.f32 %v2164_v39, %v1079_v25 }
 0x1cd   : > { %vm1154_vm7 = vcmp.gt.f32.partialorder %v1122_v1, 0.0  ;;  %v1186_v27 = vmul.f32 0.2, %v1122_v1 }
 0x1ce   : > { %vm1147_vm8 = vcmp.gt.f32.partialorder %v1115_v21, 0.0  ;;  %v1179_v26 = vmul.f32 0.2, %v1115_v21  ;;  %v1016_v13 = vpop.f32.mrf.mxu3 }
 0x1cf   : > { %v1218_v14 = vsel %vm1154_vm7, %v1122_v1, %v1186_v27  ;;  %v998_v30 = vpop.f32.mrf.mxu2  ;;  %v1051_v3 = vadd.f32 %v1016_v13, %v917_v43 }
 0x1d0   : > { %v1211_v58 = vsel %vm1147_vm8, %v1115_v21, %v1179_v26  ;;  %v1250_v41 = vpack.c.bf16 %v1218_v14, %v1218_v14  ;;  %v1044_v61 = vadd.f32 %v998_v30, %v899_v45 }
 0x1d1   : > { %v1243_v0 = vpack.c.bf16 %v1211_v58, %v1211_v58  ;;  %v1087_v15 = vmul.f32 %v2157_v23, %v1051_v3 }
 0x1d2   : > { %1283 = vst.msk [vmem:[%s2182_s10 + $0x74] sm:$0xf] %vm1253_vm11, %v1250_v41  ;;  %v1080_v22 = vmul.f32 %v2157_v23, %v1044_v61 }
 0x1d3   : > { %1276 = vst.msk [vmem:[%s2182_s10 + $0x58] sm:$0xf] %vm1253_vm11, %v1243_v0  ;;  %v1123_v8 = vadd.f32 %v2164_v39, %v1087_v15 }
 0x1d4   : > { %v1116_v34 = vadd.f32 %v2164_v39, %v1080_v22 }
 0x1d5   : > { %vm1155_vm9 = vcmp.gt.f32.partialorder %v1123_v8, 0.0  ;;  %v1187_v62 = vmul.f32 0.2, %v1123_v8 }
 0x1d6   : > { %vm1148_vm10 = vcmp.gt.f32.partialorder %v1116_v34, 0.0  ;;  %v1180_v46 = vmul.f32 0.2, %v1116_v34  ;;  %v1018_v57 = vpop.f32.mrf.mxu3 }
 0x1d7   : > { %v1219_v33 = vsel %vm1155_vm9, %v1123_v8, %v1187_v62  ;;  %v1052_v47 = vadd.f32 %v1018_v57, %v919_v24 }
 0x1d8   : > { %v1212_v50 = vsel %vm1148_vm10, %v1116_v34, %v1180_v46  ;;  %v1251_v28 = vpack.c.bf16 %v1219_v33, %v1219_v33 }
 0x1d9   : > { %v1244_v48 = vpack.c.bf16 %v1212_v50, %v1212_v50  ;;  %v1088_v53 = vmul.f32 %v2157_v23, %v1052_v47 }
 0x1da   : > { %1284 = vst.msk [vmem:[%s2182_s10 + $0x78] sm:$0xf] %vm1253_vm11, %v1251_v28 }
 0x1db   : > { %1277 = vst.msk [vmem:[%s2182_s10 + $0x5c] sm:$0xf] %vm1253_vm11, %v1244_v48  ;;  %v1124_v55 = vadd.f32 %v2164_v39, %v1088_v53 }
 0x1dd   : > { %vm1156_vm12 = vcmp.gt.f32.partialorder %v1124_v55, 0.0  ;;  %v1188_v17 = vmul.f32 0.2, %v1124_v55 }
 0x1df   : > { %v1220_v31 = vsel %vm1156_vm12, %v1124_v55, %v1188_v17 }
 0x1e0   : > { %v1252_v12 = vpack.c.bf16 %v1220_v31, %v1220_v31 }
 0x1e2   : > { %1285 = vst.msk [vmem:[%s2182_s10 + $0x7c] sm:$0xf] %vm1253_vm11, %v1252_v12 }
 0x1e3   : > { %1598 = shalt.err (!%p1595_p3)
}
 0x1e4   : > { %s1638_s8 = smov 64  }
 0x1e5   : > { %1526 = dma.vmem_to_hbm [thread:$0]  (%p1702_p5), %s1300_s20, 2048, %s1302_s19, %s1287_s22, %s1638_s8, %s1638_s8, %s1635_s6  }
 0x1e6 PF: > { %p1532_p4 = scmp.ge.s32.totalorder %s1633_s18, 2  ;;  %s1316_s9 = sand.u32 1, %s1621_s15  }
 0x1e7   : > { %s1317_s10 = scalar_lea.sflag [#allocation3], %s1316_s9 }
 0x1e8   : > { %p1529_p7 = pnand %p1532_p4, %p1706_p6 }
 0x1ea   : > { %p1530_p8 = pneg %p1529_p7 }
 0x1ec   : > { %1616 = dma.done.wait (%p1530_p8), %s1317_s10, 2048  }
 0x1ed   : > { %1618 = vsyncadd (%p1530_p8), %s1317_s10, 4294965248  ;;  %p14_p9 = scmp.ge.s32.totalorder %s1689_s21, 4   ;;  %s2418_s15 = smov %s1625_s16 }
 0x1ee   : > { %s2419_s16 = smov %s1629_s17  ;;  %s2420_s17 = smov %s1700_s24 }
 0x1ef   : > { %s2421_s18 = smov %s1689_s21  ;;  %16 = sbr.rel (!%p14_p9) target bundleno = 3 (0x3), region = 73 }
 0x1f4   :  { %1323 = vsyncpa [#allocation3], 1 }
 0x1f5   :  { %1325 = vsyncpa [#allocation3 + $0x1], 1 }

</bundles_post_ra>
